<compile_context>
chip_gen: v6e
topology: v6e:2x2x1
jax: 0.10.0
libtpu: 0.0.40
codegen_flags: <defaults>
</compile_context>

<pallas_src>
import math
import functools

import jax
import jax.numpy as jnp
from jax.experimental import pallas as pl
from jax.experimental.pallas import tpu as pltpu


# --------------------------------------------------------------------------
# Kernel
# --------------------------------------------------------------------------
def _dwconv_kernel(x_ref, w_ref, o_ref, xpad_ref, *,
                   kH, kW, stride, pad, H, W, Ho, Wo, Ct):
    """One (channel-tile, batch) block of a depthwise convolution.

    x_ref:    (1, Ct, H, W)       unpadded input block (auto-pipelined)
    w_ref:    (Ct, kH*kW, 1)      per-channel taps (unbroadcast)
    o_ref:    (1, Ct, Ho, Wo)     output block
    xpad_ref: (Ct, H+2p, W+2p)    VMEM halo scratch (in-kernel padding)
    """
    Hp, Wp = H + 2 * pad, W + 2 * pad
    K = kH * kW

    # ---- halo construction -------------------------------------------------
    # Zero ONLY the border frame (interior is fully overwritten below).  Per
    # step, not pl.when(step == 0): under v7x megacore a core may never run
    # program 0, so a zero-once scheme would leave its scratch uninitialized.
    xpad_ref[:, :pad, :] = jnp.zeros((Ct, pad, Wp), dtype=xpad_ref.dtype)
    xpad_ref[:, Hp - pad:, :] = jnp.zeros((Ct, pad, Wp), dtype=xpad_ref.dtype)
    xpad_ref[:, :, :pad] = jnp.zeros((Ct, Hp, pad), dtype=xpad_ref.dtype)
    xpad_ref[:, :, Wp - pad:] = jnp.zeros((Ct, Hp, pad), dtype=xpad_ref.dtype)

    # Land the input block in the halo interior.
    # TODO(synk): replace with a manual HBM->VMEM DMA straight into this
    # interior (x as pl.ANY) once a megacore-safe cross-step prefetch is worth
    # the W*4-byte-row DMA descriptors it produces for NCHW inputs.
    xpad_ref[:, pad:pad + H, pad:pad + W] = x_ref[0]

    # ---- weights ------------------------------------------------------------
    # Taps arrive as (Ct, K, 1); broadcast along W once per block (hoisted) so
    # the inner loop is a plain sublane-broadcast multiply.
    w = jnp.broadcast_to(w_ref[...].astype(jnp.float32), (Ct, K, Wo))

    acc = jnp.zeros((Ct, Ho, Wo), jnp.float32)

    if stride == 1:
        # One lane-offset slice per kw, reused across every kh (sublane) offset.
        for kw in range(kW):
            x_kw = xpad_ref[:, :, kw:kw + Wo].astype(jnp.float32)   # (Ct, Hp, Wo)
            for kh in range(kH):
                t = kh * kW + kw
                acc = acc + x_kw[:, kh:kh + Ho, :] * w[:, t:t + 1, :]
    else:
        # stride > 1: decompose the padded block into stride x stride phases
        # ONCE, so every tap below is a contiguous slice (VPU MACs) instead of
        # a per-tap lane/sublane-strided gather.
        xpad = xpad_ref[...].astype(jnp.float32)                    # (Ct, Hp, Wp)
        phases = []
        for ph in range(stride):
            nh = (Hp - ph + stride - 1) // stride
            rows = jax.lax.slice(xpad, (0, ph, 0),
                                 (Ct, ph + stride * (nh - 1) + 1, Wp),
                                 (1, stride, 1))
            row_phases = []
            for pw in range(stride):
                nw = (Wp - pw + stride - 1) // stride
                row_phases.append(
                    jax.lax.slice(rows, (0, 0, pw),
                                  (Ct, nh, pw + stride * (nw - 1) + 1),
                                  (1, 1, stride)))
            phases.append(row_phases)
        for kh in range(kH):
            for kw in range(kW):
                src = phases[kh % stride][kw % stride]
                patch = src[:, kh // stride:kh // stride + Ho,
                            kw // stride:kw // stride + Wo]
                t = kh * kW + kw
                acc = acc + patch * w[:, t:t + 1, :]

    # TODO(synk): present a lane-dense output (fold (Ho,Wo) onto lanes, or an
    # NHWC layout with C on lanes) when Wo < 128; blocked on Mosaic support
    # for folding a narrow minor dim in-kernel.
    o_ref[0] = acc.astype(o_ref.dtype)


# --------------------------------------------------------------------------
# VMEM-aware tiling
# --------------------------------------------------------------------------
def _vmem_budget_and_limit():
    """Per-generation VMEM budget (for tiling) and compiler limit (consistent)."""
    try:
        cap = int(pltpu.get_tpu_info().vmem_capacity_bytes)
    except Exception:
        cap = 64 * 1024 * 1024          # conservative: v7x per-core VMEM
    budget = (cap * 6) // 10            # headroom for compiler scratch / spills
    limit = min((cap * 17) // 20, 128 * 1024 * 1024)
    return budget, limit


def _estimate_step_vmem_bytes(Ct, H, W, Ho, Wo, K, kW, pad, itemsize=4):
    """Per-grid-step VMEM, padding the two minor dims of every buffer to (8,128)."""
    Hp, Wp = H + 2 * pad, W + 2 * pad

    def tiled(rows, cols):
        return (-(-max(rows, 1) // 8) * 8) * (-(-max(cols, 1) // 128) * 128)

    est = 2 * Ct * tiled(H, W)          # x block (pipeline double-buffered)
    est += 2 * Ct * tiled(Ho, Wo)       # out block (double-buffered)
    est += 2 * Ct * tiled(K, 1)         # weight block (double-buffered)
    est += Ct * tiled(Hp, Wp)           # halo scratch
    # live in-kernel temporaries: hoisted tap table, kW lane-shifted halo
    # slices, f32 accumulator (+ one patch)
    est += Ct * tiled(K, Wo)
    est += kW * Ct * tiled(Hp, Wo)
    est += 2 * Ct * tiled(Ho, Wo)
    return est * itemsize


def _pick_channel_tile(C, N, H, W, Ho, Wo, K, kW, pad, budget_bytes):
    """Largest channel tile Ct dividing C that fits the (8,128)-aware budget."""
    ct = 1
    for cand in range(1, C + 1):
        if C % cand:
            continue
        if _estimate_step_vmem_bytes(cand, H, W, Ho, Wo, K, kW, pad) <= budget_bytes:
            ct = cand
    # v7x megacore: keep >=2 grid steps along a parallel axis when possible.
    if N < 2 and ct == C and C > 1:
        ct = max(d for d in range(1, C // 2 + 1) if C % d == 0)
    # TODO(synk): if even Ct=1 exceeds the budget (very large H*W), add an
    # H-tile grid axis with a pad-row halo instead of relying on Ct=1.
    return ct


# --------------------------------------------------------------------------
# Wrapper
# --------------------------------------------------------------------------
def optimized_depthwise_forward(x_nchw, filt, stride):
    """Depthwise conv forward.

    x_nchw: (N, C, H, W)           (f32; bf16 activations also accepted — the
                                    accumulate stays f32 in-kernel)
    filt:   (C, 1, kH, kW) float32 (torch layout)
    stride: int
    returns (N, C, Ho, Wo), dtype of x
    """
    N, C, H, W = x_nchw.shape
    kH, kW = int(filt.shape[2]), int(filt.shape[3])
    assert kH == kW, "square filters only (module uses filterHeight x filterHeight)"
    if kH == 3:
        pad = 1
    elif kH == 5:
        pad = 2
    else:
        raise ValueError("filterHeight must be 3 or 5")

    Ho = (H + 2 * pad - kH) // stride + 1
    Wo = (W + 2 * pad - kW) // stride + 1
    K = kH * kW

    # Unbroadcast taps: (C,1,kH,kW) -> (C, K, 1).  Broadcast along Wo happens
    # once per block inside the kernel (cuts weight HBM traffic by Wo x).
    w_taps = filt.reshape(C, K, 1)

    budget, vmem_limit = _vmem_budget_and_limit()
    Ct = _pick_channel_tile(C, N, H, W, Ho, Wo, K, kW, pad, budget)

    # Grid: channel-tile axis OUTER, batch INNER -> the weight block index is
    # constant across consecutive steps and is not re-fetched by the pipeline.
    grid = (C // Ct, N)

    kernel = functools.partial(
        _dwconv_kernel, kH=kH, kW=kW, stride=stride, pad=pad,
        H=H, W=W, Ho=Ho, Wo=Wo, Ct=Ct)

    return pl.pallas_call(
        kernel,
        out_shape=jax.ShapeDtypeStruct((N, C, Ho, Wo), x_nchw.dtype),
        grid_spec=pltpu.PrefetchScalarGridSpec(
            num_scalar_prefetch=0,
            grid=grid,
            in_specs=[
                pl.BlockSpec((1, Ct, H, W), lambda c, n: (n, c, 0, 0)),
                pl.BlockSpec((Ct, K, 1), lambda c, n: (c, 0, 0)),
            ],
            out_specs=pl.BlockSpec((1, Ct, Ho, Wo), lambda c, n: (n, c, 0, 0)),
            scratch_shapes=[pltpu.VMEM((Ct, H + 2 * pad, W + 2 * pad), x_nchw.dtype)],
        ),
        compiler_params=pltpu.CompilerParams(
            dimension_semantics=("parallel", "parallel"),
            vmem_limit_bytes=vmem_limit,
        ),
    )(x_nchw, w_taps)


# --------------------------------------------------------------------------
# Reference + self-test
# --------------------------------------------------------------------------
def _reference_depthwise(x_nchw, filt, stride, padding):
    # pure-JAX reference (depthwise = grouped conv with groups == C)
    return jax.lax.conv_general_dilated(
        x_nchw,
        filt,
        window_strides=(stride, stride),
        padding=[(padding, padding), (padding, padding)],
        dimension_numbers=("NCHW", "OIHW", "NCHW"),
        feature_group_count=x_nchw.shape[1],
    )


if __name__ == "__main__":
    # Module config: inputChannel=4, outputChannel=4, filterHeight=3, stride=1
    N, C, H, W = 2, 4, 16, 16
    kH = 3
    stride = 1
    padding = 1

    key = jax.random.PRNGKey(0)
    kx, kw_key = jax.random.split(key)

    # Parameter init mirroring reset_parameters(): uniform(-stdv, +stdv),
    # stdv = 1/sqrt(C * kH * kH)
    stdv = 1.0 / math.sqrt(C * kH * kH)
    filt = jax.random.uniform(
        kw_key, (C, 1, kH, kH), dtype=jnp.float32, minval=-stdv, maxval=stdv
    )
    x = jax.random.normal(kx, (N, C, H, W), dtype=jnp.float32)

    out = jax.block_until_ready(optimized_depthwise_forward(x, filt, stride))

    ref = _reference_depthwise(x, filt, stride, padding)
    assert out.shape == ref.shape, (out.shape, ref.shape)
    assert jnp.allclose(out, ref, atol=1e-5, rtol=1e-5), "mismatch vs reference"

    print("KERNEL_OK")
</pallas_src>

<mosaic_0001>
module attributes {stable_mosaic.version = 11 : i64} {
  func.func @_dwconv_kernel(%arg0: i32, %arg1: i32, %arg2: memref<1x4x16x16xf32, #tpu.memory_space<vmem>>, %arg3: memref<4x9x1xf32, #tpu.memory_space<vmem>>, %arg4: memref<1x4x16x16xf32, #tpu.memory_space<vmem>>, %arg5: memref<4x18x18xf32, #tpu.memory_space<vmem>>) attributes {dimension_semantics = [#tpu.dimension_semantics<parallel>, #tpu.dimension_semantics<parallel>], iteration_bounds = array<i64: 1, 2>, scalar_prefetch = 0 : i64, scratch_operands = 1 : i64, tpu.core_type = #tpu.core_type<tc>, window_params = [{transform_indices = @transform_0, window_bounds = array<i64: 1, 4, 16, 16>}, {transform_indices = @transform_1, window_bounds = array<i64: 4, 9, 1>}, {transform_indices = @transform_2, window_bounds = array<i64: 1, 4, 16, 16>}]} {
    %cst = arith.constant 0.000000e+00 : f32
    %0 = vector.broadcast %cst : f32 to vector<4x1x18xf32>
    %c0 = arith.constant 0 : index
    %c0_0 = arith.constant 0 : index
    %c0_1 = arith.constant 0 : index
    %1 = vector.load %arg5[%c0, %c0_0, %c0_1] : memref<4x18x18xf32, #tpu.memory_space<vmem>>, vector<4x1x18xf32>
    tpu.vector_store %arg5[%c0, %c0_0, %c0_1], %0 {strides = array<i32>} : memref<4x18x18xf32, #tpu.memory_space<vmem>>, vector<4x1x18xf32>,
    %cst_2 = arith.constant 0.000000e+00 : f32
    %2 = vector.broadcast %cst_2 : f32 to vector<4x1x18xf32>
    %c0_3 = arith.constant 0 : index
    %c17 = arith.constant 17 : index
    %c0_4 = arith.constant 0 : index
    %3 = vector.load %arg5[%c0_3, %c17, %c0_4] : memref<4x18x18xf32, #tpu.memory_space<vmem>>, vector<4x1x18xf32>
    tpu.vector_store %arg5[%c0_3, %c17, %c0_4], %2 {strides = array<i32>} : memref<4x18x18xf32, #tpu.memory_space<vmem>>, vector<4x1x18xf32>,
    %cst_5 = arith.constant 0.000000e+00 : f32
    %4 = vector.broadcast %cst_5 : f32 to vector<4x18x1xf32>
    %c0_6 = arith.constant 0 : index
    %c0_7 = arith.constant 0 : index
    %c0_8 = arith.constant 0 : index
    %5 = vector.load %arg5[%c0_6, %c0_7, %c0_8] : memref<4x18x18xf32, #tpu.memory_space<vmem>>, vector<4x18x1xf32>
    tpu.vector_store %arg5[%c0_6, %c0_7, %c0_8], %4 {strides = array<i32>} : memref<4x18x18xf32, #tpu.memory_space<vmem>>, vector<4x18x1xf32>,
    %cst_9 = arith.constant 0.000000e+00 : f32
    %6 = vector.broadcast %cst_9 : f32 to vector<4x18x1xf32>
    %c0_10 = arith.constant 0 : index
    %c0_11 = arith.constant 0 : index
    %c17_12 = arith.constant 17 : index
    %7 = vector.load %arg5[%c0_10, %c0_11, %c17_12] : memref<4x18x18xf32, #tpu.memory_space<vmem>>, vector<4x18x1xf32>
    tpu.vector_store %arg5[%c0_10, %c0_11, %c17_12], %6 {strides = array<i32>} : memref<4x18x18xf32, #tpu.memory_space<vmem>>, vector<4x18x1xf32>,
    %c0_13 = arith.constant 0 : index
    %c0_14 = arith.constant 0 : index
    %c0_15 = arith.constant 0 : index
    %c0_16 = arith.constant 0 : index
    %8 = vector.load %arg2[%c0_13, %c0_14, %c0_15, %c0_16] : memref<1x4x16x16xf32, #tpu.memory_space<vmem>>, vector<1x4x16x16xf32>
    %9 = vector.shape_cast %8 : vector<1x4x16x16xf32> to vector<4x16x16xf32>
    %c0_17 = arith.constant 0 : index
    %c1 = arith.constant 1 : index
    %c1_18 = arith.constant 1 : index
    %10 = vector.load %arg5[%c0_17, %c1, %c1_18] : memref<4x18x18xf32, #tpu.memory_space<vmem>>, vector<4x16x16xf32>
    tpu.vector_store %arg5[%c0_17, %c1, %c1_18], %9 {strides = array<i32>} : memref<4x18x18xf32, #tpu.memory_space<vmem>>, vector<4x16x16xf32>,
    %c0_19 = arith.constant 0 : index
    %c0_20 = arith.constant 0 : index
    %c0_21 = arith.constant 0 : index
    %11 = vector.load %arg3[%c0_19, %c0_20, %c0_21] : memref<4x9x1xf32, #tpu.memory_space<vmem>>, vector<4x9x1xf32>
    %12 = vector.shape_cast %11 : vector<4x9x1xf32> to vector<4x9x1xf32>
    %13 = vector.broadcast %12 : vector<4x9x1xf32> to vector<4x9x16xf32>
    %cst_22 = arith.constant 0.000000e+00 : f32
    %14 = vector.broadcast %cst_22 : f32 to vector<4x16x16xf32>
    %c0_23 = arith.constant 0 : index
    %c0_24 = arith.constant 0 : index
    %c0_25 = arith.constant 0 : index
    %15 = vector.load %arg5[%c0_23, %c0_24, %c0_25] : memref<4x18x18xf32, #tpu.memory_space<vmem>>, vector<4x18x16xf32>
    %16 = vector.extract_strided_slice %15 {offsets = [0, 0, 0], sizes = [4, 16, 16], strides = [1, 1, 1]} : vector<4x18x16xf32> to vector<4x16x16xf32>
    %17 = vector.extract_strided_slice %13 {offsets = [0, 0, 0], sizes = [4, 1, 16], strides = [1, 1, 1]} : vector<4x9x16xf32> to vector<4x1x16xf32>
    %18 = vector.broadcast %17 : vector<4x1x16xf32> to vector<4x16x16xf32>
    %19 = arith.mulf %16, %18 : vector<4x16x16xf32>
    %20 = arith.addf %14, %19 : vector<4x16x16xf32>
    %21 = vector.extract_strided_slice %15 {offsets = [0, 1, 0], sizes = [4, 16, 16], strides = [1, 1, 1]} : vector<4x18x16xf32> to vector<4x16x16xf32>
    %22 = vector.extract_strided_slice %13 {offsets = [0, 3, 0], sizes = [4, 1, 16], strides = [1, 1, 1]} : vector<4x9x16xf32> to vector<4x1x16xf32>
    %23 = vector.broadcast %22 : vector<4x1x16xf32> to vector<4x16x16xf32>
    %24 = arith.mulf %21, %23 : vector<4x16x16xf32>
    %25 = arith.addf %20, %24 : vector<4x16x16xf32>
    %26 = vector.extract_strided_slice %15 {offsets = [0, 2, 0], sizes = [4, 16, 16], strides = [1, 1, 1]} : vector<4x18x16xf32> to vector<4x16x16xf32>
    %27 = vector.extract_strided_slice %13 {offsets = [0, 6, 0], sizes = [4, 1, 16], strides = [1, 1, 1]} : vector<4x9x16xf32> to vector<4x1x16xf32>
    %28 = vector.broadcast %27 : vector<4x1x16xf32> to vector<4x16x16xf32>
    %29 = arith.mulf %26, %28 : vector<4x16x16xf32>
    %30 = arith.addf %25, %29 : vector<4x16x16xf32>
    %c0_26 = arith.constant 0 : index
    %c0_27 = arith.constant 0 : index
    %c1_28 = arith.constant 1 : index
    %31 = vector.load %arg5[%c0_26, %c0_27, %c1_28] : memref<4x18x18xf32, #tpu.memory_space<vmem>>, vector<4x18x16xf32>
    %32 = vector.extract_strided_slice %31 {offsets = [0, 0, 0], sizes = [4, 16, 16], strides = [1, 1, 1]} : vector<4x18x16xf32> to vector<4x16x16xf32>
    %33 = vector.extract_strided_slice %13 {offsets = [0, 1, 0], sizes = [4, 1, 16], strides = [1, 1, 1]} : vector<4x9x16xf32> to vector<4x1x16xf32>
    %34 = vector.broadcast %33 : vector<4x1x16xf32> to vector<4x16x16xf32>
    %35 = arith.mulf %32, %34 : vector<4x16x16xf32>
    %36 = arith.addf %30, %35 : vector<4x16x16xf32>
    %37 = vector.extract_strided_slice %31 {offsets = [0, 1, 0], sizes = [4, 16, 16], strides = [1, 1, 1]} : vector<4x18x16xf32> to vector<4x16x16xf32>
    %38 = vector.extract_strided_slice %13 {offsets = [0, 4, 0], sizes = [4, 1, 16], strides = [1, 1, 1]} : vector<4x9x16xf32> to vector<4x1x16xf32>
    %39 = vector.broadcast %38 : vector<4x1x16xf32> to vector<4x16x16xf32>
    %40 = arith.mulf %37, %39 : vector<4x16x16xf32>
    %41 = arith.addf %36, %40 : vector<4x16x16xf32>
    %42 = vector.extract_strided_slice %31 {offsets = [0, 2, 0], sizes = [4, 16, 16], strides = [1, 1, 1]} : vector<4x18x16xf32> to vector<4x16x16xf32>
    %43 = vector.extract_strided_slice %13 {offsets = [0, 7, 0], sizes = [4, 1, 16], strides = [1, 1, 1]} : vector<4x9x16xf32> to vector<4x1x16xf32>
    %44 = vector.broadcast %43 : vector<4x1x16xf32> to vector<4x16x16xf32>
    %45 = arith.mulf %42, %44 : vector<4x16x16xf32>
    %46 = arith.addf %41, %45 : vector<4x16x16xf32>
    %c0_29 = arith.constant 0 : index
    %c0_30 = arith.constant 0 : index
    %c2 = arith.constant 2 : index
    %47 = vector.load %arg5[%c0_29, %c0_30, %c2] : memref<4x18x18xf32, #tpu.memory_space<vmem>>, vector<4x18x16xf32>
    %48 = vector.extract_strided_slice %47 {offsets = [0, 0, 0], sizes = [4, 16, 16], strides = [1, 1, 1]} : vector<4x18x16xf32> to vector<4x16x16xf32>
    %49 = vector.extract_strided_slice %13 {offsets = [0, 2, 0], sizes = [4, 1, 16], strides = [1, 1, 1]} : vector<4x9x16xf32> to vector<4x1x16xf32>
    %50 = vector.broadcast %49 : vector<4x1x16xf32> to vector<4x16x16xf32>
    %51 = arith.mulf %48, %50 : vector<4x16x16xf32>
    %52 = arith.addf %46, %51 : vector<4x16x16xf32>
    %53 = vector.extract_strided_slice %47 {offsets = [0, 1, 0], sizes = [4, 16, 16], strides = [1, 1, 1]} : vector<4x18x16xf32> to vector<4x16x16xf32>
    %54 = vector.extract_strided_slice %13 {offsets = [0, 5, 0], sizes = [4, 1, 16], strides = [1, 1, 1]} : vector<4x9x16xf32> to vector<4x1x16xf32>
    %55 = vector.broadcast %54 : vector<4x1x16xf32> to vector<4x16x16xf32>
    %56 = arith.mulf %53, %55 : vector<4x16x16xf32>
    %57 = arith.addf %52, %56 : vector<4x16x16xf32>
    %58 = vector.extract_strided_slice %47 {offsets = [0, 2, 0], sizes = [4, 16, 16], strides = [1, 1, 1]} : vector<4x18x16xf32> to vector<4x16x16xf32>
    %59 = vector.extract_strided_slice %13 {offsets = [0, 8, 0], sizes = [4, 1, 16], strides = [1, 1, 1]} : vector<4x9x16xf32> to vector<4x1x16xf32>
    %60 = vector.broadcast %59 : vector<4x1x16xf32> to vector<4x16x16xf32>
    %61 = arith.mulf %58, %60 : vector<4x16x16xf32>
    %62 = arith.addf %57, %61 : vector<4x16x16xf32>
    %c0_31 = arith.constant 0 : index
    %c0_32 = arith.constant 0 : index
    %c0_33 = arith.constant 0 : index
    %c0_34 = arith.constant 0 : index
    %63 = vector.load %arg4[%c0_31, %c0_32, %c0_33, %c0_34] : memref<1x4x16x16xf32, #tpu.memory_space<vmem>>, vector<1x4x16x16xf32>
    %64 = vector.shape_cast %63 : vector<1x4x16x16xf32> to vector<4x16x16xf32>
    %65 = vector.shape_cast %62 : vector<4x16x16xf32> to vector<1x4x16x16xf32>
    tpu.vector_store %arg4[%c0_31, %c0_32, %c0_33, %c0_34], %65 {strides = array<i32>} : memref<1x4x16x16xf32, #tpu.memory_space<vmem>>, vector<1x4x16x16xf32>,
    return
  }
  func.func @transform_0(%arg0: i32, %arg1: i32) -> (i32, i32, i32, i32) {
    %c0_i32 = arith.constant 0 : i32
    %c0_i32_0 = arith.constant 0 : i32
    %c0_i32_1 = arith.constant 0 : i32
    return %arg1, %arg0, %c0_i32, %c0_i32_0 : i32, i32, i32, i32
  }
  func.func @transform_1(%arg0: i32, %arg1: i32) -> (i32, i32, i32) {
    %c0_i32 = arith.constant 0 : i32
    %c0_i32_0 = arith.constant 0 : i32
    %c0_i32_1 = arith.constant 0 : i32
    return %arg0, %c0_i32, %c0_i32_0 : i32, i32, i32
  }
  func.func @transform_2(%arg0: i32, %arg1: i32) -> (i32, i32, i32, i32) {
    %c0_i32 = arith.constant 0 : i32
    %c0_i32_0 = arith.constant 0 : i32
    %c0_i32_1 = arith.constant 0 : i32
    return %arg1, %arg0, %c0_i32, %c0_i32_0 : i32, i32, i32, i32
  }
}

</mosaic_0001>

<bundles_post_ra>
// kernel: tpu_custom_call.1
= control target key start
LH: loop header
LB: loop body
LE: loop exit
PB: predicated region body
PF: predicated region fallthrough
CT: control target
= control target key end

     0   :  { %s2315_s0 = inlined_call_operand.hbm [shape: f32[2,4,16,16], index: 0, kind: input, shape index: {}]   ;;  %s2316_s1 = inlined_call_operand.vmem [shape: f32[4,9,1], index: 1, kind: input, shape index: {}]   ;;  %s2317_s2 = inlined_call_operand.hbm [shape: f32[2,4,16,16], index: 2, kind: output, shape index: {}]  }
   0x1   :  { %2339 = sst [smem:[#allocation27_spill]] %s2315_s0 }
   0x2   :  { %2340 = sst [smem:[#allocation28_spill]] %s2316_s1 }
   0x3   :  { %7 = vsyncpa [#allocation4], 0 }
   0x4   :  { %9 = vsyncpa [#allocation4 + $0x1], 0 }
   0x5   :  { %10 = vsyncpa [#allocation5], 0 }
   0x6   :  { %12 = vsyncpa [#allocation5 + $0x1], 0  ;;  %s1419_s9 = smov 0   ;;  %s1421_s10 = smov 0  }
   0x7   :  { %s1423_s11 = smov 0   ;;  %s1425_s12 = smov 0  }
   0x8   :  { %s1427_s13 = smov 0   ;;  %s1429_s14 = smov 0  }
   0x9 LB: > { %2341 = sst [smem:[#allocation9_spill]] %s1376_s10  ;;  %s1124_s15 = sadd.s32 4294967295, %s1392_s14   ;;  %s1392_s14 = sphi %s1429_s14, %s18_s14   ;;  %s1388_s13 = sphi %s1427_s13, %s2428_s13   ;;  %s1384_s12 = sphi %s1425_s12, %s2427_s12   ;;  %s1380_s11 = sphi %s1423_s11, %s2426_s11   ;;  %s1376_s10 = sphi %s1421_s10, %s2425_s10   ;;  %s1372_s9 = sphi %s1419_s9, %s2424_s9  }
   0xa   : > { %2342 = sst [smem:[#allocation10_spill]] %s1380_s11  ;;  %s1125_s16 = sadd.s32 4294967294, %s1392_s14  }
   0xb   : > { %2343 = sst [smem:[#allocation11_spill]] %s1388_s13  ;;  %s27_s17 = sadd.s32 1, %s1388_s13 }
   0xc   : > { %2344 = sst [smem:[#allocation12_spill]] %s1392_s14  ;;  %s39_s18 = sadd.s32 1, %s1380_s11 }
   0xd   : > { %p28_p0 = scmp.ge.s32.totalorder %s27_s17, 2  ;;  %p46_p1 = scmp.ne.s32.totalorder %s1380_s11, %s1376_s10 }
   0xe   : > { %p47_p2 = scmp.eq.s32.totalorder %s1392_s14, 0  ;;  %p52_p3 = scmp.ne.s32.totalorder %s1376_s10, %s1372_s9 }
   0xf   : > { %s2430_s17 = smov (%p28_p0, %s27_s17), 0  ;;  %p53_p5 = scmp.eq.s32.totalorder %s1124_s15, 0 }
  0x10   : > { %2345 = sst [smem:[#allocation13_spill]] %s2430_s17  ;;  %p1460_p4 = por %p47_p2, %p46_p1 }
  0x11   : > { %s34_s20 = ssub.s32 %s1388_s13, %s2430_s17  ;;  %p104_p6 = scmp.eq.s32.totalorder %s1124_s15, 1 }
  0x12   : > { %p37_p7 = scmp.eq.s32.totalorder %s34_s20, 0  ;;  %p1466_p8 = por %p53_p5, %p52_p3 }
  0x13   : > { %p1470_p9 = por %p104_p6, %p46_p1  ;;  %p110_p10 = scmp.eq.s32.totalorder %s1125_s16, 1 }
  0x14   : > { %s1475_s23 = scalar_select %p37_p7, %s1380_s11, %s39_s18  }
  0x15   : > { %p1477_p11 = por %p110_p10, %p52_p3  ;;  %p1226_p13 = scmp.lt.s32.totalorder %s1392_s14, 2 }
  0x16   : > { %2349 = sst [smem:[#allocation14_spill]] %s1475_s23  ;;  %s140_s25 = sand.u32 1, %s1380_s11  }
  0x17   : > { %s2350_s24 = scalar_select %p1477_p11, 1, 0 }
  0x18   : > { %s1129_s26 = sshll.u32 %s140_s25, 6  ;;  %s1140_s27 = sshll.u32 %s1388_s13, 10 }
  0x19   : > { %2351 = sst [smem:[#allocation15_spill]] %s2350_s24  ;;  %s144_s3 = scalar_lea.vmem [#allocation3], %s1129_s26 }
  0x1a   : > { %s2352_s0 = sld [smem:[#allocation27_spill]]  ;;  %s154_s4 = sshll.u32 %s144_s3, 4  ;;  %s155_s4 = int_to_ptr.vmem [resolvable:$true] %s154_s4 }
  0x1b   : > { %p1490_p0 = pnand %p1226_p13, %p1460_p4  ;;  %p1132_p1 = scmp.ge.s32.totalorder %s1392_s14, 1 }
  0x1c   : > { %s141_s6 = scalar_lea.sflag [#allocation4], %s140_s25  ;;  %s1297_s7 = scalar_lea.vmem %s155_s4, 1024 }
  0x1d   : > { %p1286_p2 = pneg %p1490_p0  ;;  %p1298_p3 = scmp.ne.s32.totalorder %s155_s4, %s1297_s7 }
  0x1e   : > { %s1394_s8 = smov [#allocation3]  }
  0x1f   : > { %p1300_p5 = pnand %p1298_p3, %p1286_p2  ;;  %s1302_s15 = sshll.u32 %s1394_s8, 4  ;;  %s1303_s15 = int_to_ptr.vmem [resolvable:$false] %s1302_s15 }
  0x20   : > { %s153_s30 = scalar_lea.hbm %s2352_s0, %s1140_s27  ;;  %s1304_s16 = scalar_lea.vmem %s1303_s15, 2048 }
  0x21   : > { %p1301_p6 = pneg %p1300_p5  ;;  %p1305_p7 = scmp.lt.s32.totalorder %s155_s4, %s1303_s15 }
  0x22   : > { %p1306_p10 = scmp.lt.s32.totalorder %s1304_s16, %s1297_s7 }
  0x24   : > { %p1307_p12 = por %p1306_p10, %p1305_p7 }
  0x26   : > { %p1308_p4 = pnand %p1307_p12, %p1301_p6 }
  0x28   : > { %1311 = shalt.err (!%p1308_p4)
}
  0x29   : > { %s1395_s18 = smov 128   ;;  %s1396_s19 = smov 8  }
  0x2a   : > { %1221 = dma.hbm_to_vmem [thread:$0]  (!%p1490_p0), %s153_s30, 1024, %s155_s4, %s141_s6, %s1395_s18, %s1395_s18, %s1396_s19  }
  0x2b   : > { %p162_p13 = scmp.lt.s32.totalorder %s1392_s14, 3 }
  0x2d   : > { %p163_p2 = pnand %p1132_p1, %p162_p13 }
  0x2f   : > { %166 = sbr.rel (%p163_p2) target bundleno = 415 (0x19f), region = 28 }
  0x34   : > { %s1503_s20 = sand.u32 1, %s1376_s10  }
  0x35   : > { %s2318_s25 = sshll.u32 %s1503_s20, 6  ;;  %s169_s26 = scalar_lea.sflag [#allocation4], %s1503_s20 }
  0x36   : > { %s1509_s27 = scalar_lea.vmem [#allocation3], %s2318_s25 }
  0x37   : > { %1363 = dma.done.wait (%p1466_p8), %s169_s26, 1024  }
  0x38   : > { %1365 = vsyncadd (%p1466_p8), %s169_s26, 4294966272  ;;  %vm208_vm0 = vcmask 139264   ;;  %vm217_vm1 = vcmask 7168   ;;  %vm231_vm2 = vcmask 146568   ;;  %v1397_v0 = vmov 0.0   ;;  %v247_v1 = vld [vmem:[%s1509_s27 + $0x10] sm:$0xff] }
  0x39   : > { %210 = vst.msk [vmem:[#allocation2 + $0x18] sm:$0x1] %vm208_vm0, %v1397_v0  ;;  %209 = vst.msk [vmem:[#allocation2] sm:$0x1] %vm208_vm0, %v1397_v0  ;;  %vm220_vm3 = vcmask 1024   ;;  %vm234_vm4 = vcmask 140424  }
  0x3a   : > { %223 = vst.msk [vmem:[#allocation2 + $0x20] sm:$0xff] %vm217_vm1, %v1397_v0  ;;  %219 = vst.msk [vmem:[#allocation2 + $0x8] sm:$0xff] %vm217_vm1, %v1397_v0  ;;  %v245_v2 = vld [vmem:[%s1509_s27] sm:$0xff]  ;;  %s1398_s21 = smov 1   ;;  %v248_v3 = vld [vmem:[%s1509_s27 + $0x18] sm:$0xff]  ;;  %s2354_s1 = sld [smem:[#allocation28_spill]] }
  0x3b   : > { %211 = vst.msk [vmem:[#allocation2 + $0x30] sm:$0x1] %vm208_vm0, %v1397_v0  ;;  %212 = vst.msk [vmem:[#allocation2 + $0x48] sm:$0x1] %vm208_vm0, %v1397_v0  ;;  %265 = vrot.lane.b32.xlu1 %v247_v1, %s1398_s21  ;;  %261 = vrot.lane.b32.xlu0 %v245_v2, %s1398_s21  ;;  %v246_v4 = vld [vmem:[%s1509_s27 + $0x8] sm:$0xff]  ;;  %v249_v12 = vld [vmem:[%s1509_s27 + $0x20] sm:$0xff] }
  0x3c   : > { %213 = vst.msk [vmem:[#allocation2 + $0x11] sm:$0x1] %vm208_vm0, %v1397_v0  ;;  %214 = vst.msk [vmem:[#allocation2 + $0x29] sm:$0x1] %vm208_vm0, %v1397_v0  ;;  %v250_v11 = vld [vmem:[%s1509_s27 + $0x28] sm:$0xff]  ;;  %v252_v17 = vld [vmem:[%s1509_s27 + $0x38] sm:$0xff] }
  0x3d   : > { %215 = vst.msk [vmem:[#allocation2 + $0x41] sm:$0x1] %vm208_vm0, %v1397_v0  ;;  %216 = vst.msk [vmem:[#allocation2 + $0x59] sm:$0x1] %vm208_vm0, %v1397_v0  ;;  %v251_v18 = vld [vmem:[%s1509_s27 + $0x30] sm:$0xff]  ;;  %vm285_vm5 = vcmask 138248  }
  0x3e   : > { %226 = vst.msk [vmem:[#allocation2 + $0x38] sm:$0xff] %vm217_vm1, %v1397_v0  ;;  %229 = vst.msk [vmem:[#allocation2 + $0x50] sm:$0xff] %vm217_vm1, %v1397_v0  ;;  %vm386_vm6 = vcmask 1046528   ;;  %vm463_vm7 = vcmask 1045504   ;;  %vm996_vm8 = vcmask 130048  }
  0x3f   : > { %222 = vst.msk [vmem:[#allocation2 + $0x18] sm:$0xff] %vm217_vm1, %v1397_v0  ;;  %218 = vst.msk [vmem:[#allocation2] sm:$0xff] %vm217_vm1, %v1397_v0  ;;  %267 = vrot.lane.b32.xlu1 %v248_v3, %s1398_s21  ;;  %263 = vrot.lane.b32.xlu0 %v246_v4, %s1398_s21 }
  0x40   : > { %237 = vst.msk [vmem:[#allocation2 + $0x20] sm:$0xff] %vm231_vm2, %v1397_v0  ;;  %233 = vst.msk [vmem:[#allocation2 + $0x8] sm:$0xff] %vm231_vm2, %v1397_v0  ;;  %v1544_v5 = vld [vmem:[%s2354_s1] sm:$0xff]  ;;  %v1549_v6 = vld [vmem:[%s2354_s1 + $0x10] sm:$0xff] }
  0x41   : > { %225 = vst.msk [vmem:[#allocation2 + $0x30] sm:$0xff] %vm217_vm1, %v1397_v0  ;;  %228 = vst.msk [vmem:[#allocation2 + $0x48] sm:$0xff] %vm217_vm1, %v1397_v0  ;;  %v1554_v7 = vld [vmem:[%s2354_s1 + $0x20] sm:$0xff]  ;;  %v1560_v8 = vld [vmem:[%s2354_s1 + $0x30] sm:$0xff]  ;;  %v346_v9 = vrot.slane %v1544_v5, 3  ;;  %v347_v10 = vrot.slane %v1549_v6, 3 }
  0x42   : > { %240 = vst.msk [vmem:[#allocation2 + $0x38] sm:$0xff] %vm231_vm2, %v1397_v0  ;;  %243 = vst.msk [vmem:[#allocation2 + $0x50] sm:$0xff] %vm231_vm2, %v1397_v0  ;;  %v348_v13 = vrot.slane %v1554_v7, 3  ;;  %v349_v14 = vrot.slane %v1560_v8, 3  ;;  %v423_v15 = vrot.slane %v1544_v5, 6  ;;  %v424_v16 = vrot.slane %v1549_v6, 6 }
  0x43   : > { %224 = vst.msk [vmem:[#allocation2 + $0x28] sm:$0x3] %vm220_vm3, %v1397_v0  ;;  %221 = vst.msk [vmem:[#allocation2 + $0x10] sm:$0x3] %vm220_vm3, %v1397_v0  ;;  %271 = vrot.lane.b32.xlu1 %v250_v11, %s1398_s21  ;;  %269 = vrot.lane.b32.xlu0 %v249_v12, %s1398_s21  ;;  %v425_v19 = vrot.slane %v1554_v7, 6  ;;  %v426_v20 = vrot.slane %v1560_v8, 6 }
  0x44   : > { %227 = vst.msk [vmem:[#allocation2 + $0x40] sm:$0x3] %vm220_vm3, %v1397_v0  ;;  %230 = vst.msk [vmem:[#allocation2 + $0x58] sm:$0x3] %vm220_vm3, %v1397_v0  ;;  %v500_v21 = vrot.slane %v1544_v5, 1  ;;  %v501_v22 = vrot.slane %v1549_v6, 1 }
  0x45   : > { %236 = vst.msk [vmem:[#allocation2 + $0x18] sm:$0xff] %vm231_vm2, %v1397_v0  ;;  %232 = vst.msk [vmem:[#allocation2] sm:$0xff] %vm231_vm2, %v1397_v0  ;;  %v502_v23 = vrot.slane %v1554_v7, 1  ;;  %v503_v24 = vrot.slane %v1560_v8, 1  ;;  %v564_v25 = vrot.slane %v1544_v5, 4  ;;  %v565_v26 = vrot.slane %v1549_v6, 4 }
  0x46   : > { %238 = vst.msk [vmem:[#allocation2 + $0x28] sm:$0x3] %vm234_vm4, %v1397_v0  ;;  %235 = vst.msk [vmem:[#allocation2 + $0x10] sm:$0x3] %vm234_vm4, %v1397_v0  ;;  %v566_v27 = vrot.slane %v1554_v7, 4  ;;  %v567_v28 = vrot.slane %v1560_v8, 4 }
  0x47   : > { %239 = vst.msk [vmem:[#allocation2 + $0x30] sm:$0xff] %vm231_vm2, %v1397_v0  ;;  %242 = vst.msk [vmem:[#allocation2 + $0x48] sm:$0xff] %vm231_vm2, %v1397_v0  ;;  %275 = vrot.lane.b32.xlu1 %v252_v17, %s1398_s21  ;;  %273 = vrot.lane.b32.xlu0 %v251_v18, %s1398_s21  ;;  %v656_v29 = vrot.slane %v1544_v5, 7  ;;  %v657_v30 = vrot.slane %v1549_v6, 7  ;;  %v658_v31 = vrot.slane %v1554_v7, 7  ;;  %v659_v32 = vrot.slane %v1560_v8, 7 }
  0x48   : > { %241 = vst.msk [vmem:[#allocation2 + $0x40] sm:$0x3] %vm234_vm4, %v1397_v0  ;;  %244 = vst.msk [vmem:[#allocation2 + $0x58] sm:$0x3] %vm234_vm4, %v1397_v0  ;;  %v748_v33 = vrot.slane %v1544_v5, 2  ;;  %v749_v34 = vrot.slane %v1549_v6, 2 }
  0x49   : > { %1142 = vpush %v1544_v5  ;;  %v750_v35 = vrot.slane %v1554_v7, 2  ;;  %v751_v36 = vrot.slane %v1560_v8, 2  ;;  %v812_v37 = vrot.slane %v1544_v5, 5  ;;  %v813_v38 = vrot.slane %v1549_v6, 5  ;;  %v295_v41 = vld [vmem:[%s2354_s1 + $0x8] sm:$0x1] }
  0x4a   : > { %1144 = vpush %v1549_v6  ;;  %v814_v39 = vrot.slane %v1554_v7, 5  ;;  %v815_v40 = vrot.slane %v1560_v8, 5  ;;  %v297_v42 = vld [vmem:[%s2354_s1 + $0x18] sm:$0x1]  ;;  %v299_v43 = vld [vmem:[%s2354_s1 + $0x28] sm:$0x1] }
  0x4b   : > { %1146 = vpush %v1554_v7  ;;  %v301_v44 = vld [vmem:[%s2354_s1 + $0x38] sm:$0x1] }
  0x4c   : > { %1148 = vpush %v1560_v8 }
  0x4d   : > { %1150 = vpush %v346_v9 }
  0x4e   : > { %1152 = vpush %v347_v10 }
  0x4f   : > { %1154 = vpush %v348_v13 }
  0x50   : > { %1156 = vpush %v349_v14 }
  0x51   : > { %1158 = vpush %v423_v15 }
  0x52   : > { %1160 = vpush %v424_v16 }
  0x53   : > { %1162 = vpush %v425_v19 }
  0x54   : > { %1164 = vpush %v426_v20 }
  0x55   : > { %1166 = vpush %v500_v21 }
  0x56   : > { %1168 = vpush %v501_v22 }
  0x57   : > { %1170 = vpush %v502_v23 }
  0x58   : > { %1172 = vpush %v503_v24 }
  0x59   : > { %1174 = vpush %v564_v25 }
  0x5a   : > { %1176 = vpush %v565_v26 }
  0x5b   : > { %1178 = vpush %v566_v27 }
  0x5c   : > { %1180 = vpush %v567_v28 }
  0x5d   : > { %1182 = vpush %v656_v29 }
  0x5e   : > { %1184 = vpush %v657_v30 }
  0x5f   : > { %1186 = vpush %v658_v31 }
  0x60   : > { %1188 = vpush %v659_v32 }
  0x61   : > { %1190 = vpush %v748_v33 }
  0x62   : > { %1192 = vpush %v749_v34 }
  0x63   : > { %1194 = vpush %v750_v35 }
  0x64   : > { %1196 = vpush %v751_v36 }
  0x65   : > { %1198 = vpush %v812_v37 }
  0x66   : > { %1200 = vpush %v813_v38 }
  0x67   : > { %1202 = vpush %v814_v39 }
  0x68   : > { %1204 = vpush %v815_v40 }
  0x69   : > { %1206 = vpush %v295_v41 }
  0x6a   : > { %1208 = vpush %v297_v42 }
  0x6b   : > { %1210 = vpush %v299_v43 }
  0x6c   : > { %1212 = vpush %v301_v44 }
  0x7a   : > { %s1615_s28 = spop %1142 }
  0x7b   : > { %s1617_s29 = spop %1144  ;;  %v316_v49 = vstv %s1615_s28 }
  0x7c   : > { %s1619_s30 = spop %1146  ;;  %v320_v50 = vstv %s1617_s29 }
  0x7d   : > { %s1621_s3 = spop %1148 }
  0x7e   : > { %s1623_s4 = spop %1150 }
  0x7f   : > { %s1625_s5 = spop %1152  ;;  %v351_v51 = vstv %s1623_s4  ;;  %s2326_s4 = smov 127  }
  0x80   : > { %s1627_s6 = spop %1154  ;;  %v354_v52 = vstv %s1625_s5 }
  0x81   : > { %s1629_s7 = spop %1156  ;;  %v1760_v25 = vstv %s1627_s6 }
  0x82   : > { %s1159_s8 = spop %1158  ;;  %v1763_v26 = vstv %s1629_s7 }
  0x83   : > { %s1161_s15 = spop %1160  ;;  %v428_v53 = vstv %s1159_s8 }
  0x84   : > { %s1631_s16 = spop %1162  ;;  %v431_v54 = vstv %s1161_s15 }
  0x85   : > { %s1633_s18 = spop %1164  ;;  %v1766_v27 = vstv %s1631_s16 }
  0x86   : > { %s1635_s19 = spop %1166  ;;  %v1769_v28 = vstv %s1633_s18 }
  0x87   : > { %s1637_s26 = spop %1168  ;;  %v505_v55 = vstv %s1635_s19 }
  0x88   : > { %s1639_s27 = spop %1170  ;;  %v508_v58 = vstv %s1637_s26 }
  0x89   : > { %s1641_s21 = spop %1172  ;;  %v511_v29 = vstv %s1639_s27 }
  0x8a   : > { %s1643_s25 = spop %1174  ;;  %v514_v30 = vstv %s1641_s21 }
  0x8b   : > { %s1645_s0 = spop %1176  ;;  %v569_v31 = vstv %s1643_s25 }
  0x8c   : > { %s1647_s1 = spop %1178  ;;  %v572_v32 = vstv %s1645_s0  ;;  %s2362_s0 = smov 127  }
  0x8d   : > { %s1649_s17 = spop %1180  ;;  %v1776_v33 = vstv %s1647_s1  ;;  %s1400_s1 = smov 126  }
  0x8e   : > { %s1653_s13 = spop %1182  ;;  %v1779_v34 = vstv %s1649_s17 }
  0x8f   : > { %s1655_s23 = spop %1184  ;;  %v1784_v36 = vstv %s1653_s13  ;;  %s1141_s13 = sshll.u32 %s1384_s12, 10 }
  0x90   : > { %s1659_s11 = spop %1186  ;;  %v1787_v37 = vstv %s1655_s23  ;;  %s1006_s12 = scalar_lea.sflag [#allocation5], %s1503_s20 }
  0x91   : > { %s1666_s10 = spop %1188 }
  0x92   : > { %s1685_s28 = spop %1190 }
  0x93   : > { %s1696_s29 = spop %1192  ;;  %v753_v38 = vstv %s1685_s28 }
  0x94   : > { %s1720_s5 = spop %1194  ;;  %v2328_v39 = vstv %s1696_s29 }
  0x95   : > { %s1742_s8 = spop %1196 }
  0x96   : > { %s1746_s15 = spop %1198 }
  0x97   : > { %s1748_s19 = spop %1200  ;;  %v1794_v42 = vstv %s1746_s15 }
  0x98   : > { %s1752_s26 = spop %1202  ;;  %2356 = vst [vmem:[#allocation17_spill] sm:$0xff] %v1794_v42  ;;  %v1797_v43 = vstv %s1748_s19 }
  0x99   : > { %s1754_s14 = spop %1204  ;;  %2357 = vst [vmem:[#allocation18_spill] sm:$0xff] %v1797_v43 }
  0x9a   : > { %s1207_s24 = spop %1206 }
  0xad   : > { %v266_v45 = vpop.permute.xlu1 %265  ;;  %v262_v46 = vpop.permute.xlu0 %261 }
  0xae   : > { %288 = vst.msk [vmem:[#allocation2 + $0x19] sm:$0xff] %vm285_vm5, %v266_v45  ;;  %286 = vst.msk [vmem:[#allocation2 + $0x1] sm:$0xff] %vm285_vm5, %v262_v46  ;;  %v1801_v45 = vstv %s1207_s24  ;;  %s2261_s24 = scalar_lea.hbm %s2317_s2, %s1141_s13 }
  0xaf   : > { %2358 = vst [vmem:[#allocation19_spill] sm:$0xff] %v1801_v45 }
  0xb1   : > { %v268_v47 = vpop.permute.xlu1 %267  ;;  %v264_v48 = vpop.permute.xlu0 %263 }
  0xb2   : > { %289 = vst.msk [vmem:[#allocation2 + $0x21] sm:$0xff] %vm285_vm5, %v268_v47  ;;  %287 = vst.msk [vmem:[#allocation2 + $0x9] sm:$0xff] %vm285_vm5, %v264_v48 }
  0xb5   : > { %v1668_v56 = vld [vmem:[#allocation2] sm:$0xff]  ;;  %v1670_v57 = vld [vmem:[#allocation2 + $0x18] sm:$0xff]  ;;  %v272_v59 = vpop.permute.xlu1 %271  ;;  %v270_v60 = vpop.permute.xlu0 %269 }
  0xb6   : > { %v1674_v61 = vmul.f32 %v316_v49, %v1668_v56  ;;  %v1677_v62 = vmul.f32 %v320_v50, %v1670_v57  ;;  %v1680_v63 = vmul.f32 %v351_v51, %v1668_v56  ;;  %v1683_v0 = vmul.f32 %v354_v52, %v1670_v57  ;;  %291 = vst.msk [vmem:[#allocation2 + $0x39] sm:$0xff] %vm285_vm5, %v272_v59 }
  0xb7   : > { %290 = vst.msk [vmem:[#allocation2 + $0x31] sm:$0xff] %vm285_vm5, %v270_v60  ;;  %v1690_v1 = vmul.f32 %v428_v53, %v1668_v56  ;;  %v1693_v2 = vmul.f32 %v431_v54, %v1670_v57  ;;  %v516_v3 = vmul.f32 %v505_v55, %v1668_v56  ;;  %v518_v7 = vmul.f32 %v508_v58, %v1670_v57 }
  0xb9   : > { %v1698_v4 = vld [vmem:[#allocation2 + $0x8] sm:$0xff]  ;;  %v1700_v5 = vld [vmem:[#allocation2 + $0x20] sm:$0xff]  ;;  %v1702_v6 = vld [vmem:[#allocation2 + $0x10] sm:$0x3]  ;;  %532 = vrot.lane.b32.xlu0 %v516_v3, %s2326_s4  ;;  %v276_v8 = vpop.permute.xlu1 %275  ;;  %v274_v9 = vpop.permute.xlu0 %273 }
  0xba   : > { %v1707_v10 = vmul.f32 %v316_v49, %v1698_v4  ;;  %v1710_v11 = vmul.f32 %v320_v50, %v1700_v5  ;;  %v1713_v12 = vmul.f32 %v351_v51, %v1698_v4  ;;  %v1716_v13 = vmul.f32 %v351_v51, %v1702_v6  ;;  %v1718_v14 = vld [vmem:[#allocation2 + $0x28] sm:$0x3]  ;;  %293 = vst.msk [vmem:[#allocation2 + $0x51] sm:$0xff] %vm285_vm5, %v276_v8 }
  0xbb   : > { %2355 = vst [vmem:[#allocation16_spill] sm:$0xff] %v1718_v14  ;;  %292 = vst.msk [vmem:[#allocation2 + $0x49] sm:$0xff] %vm285_vm5, %v274_v9  ;;  %v1725_v15 = vmul.f32 %v354_v52, %v1700_v5  ;;  %v1728_v16 = vmul.f32 %v354_v52, %v1718_v14  ;;  %v1731_v17 = vmul.f32 %v428_v53, %v1698_v4 }
  0xbc   : > { %v1734_v18 = vmul.f32 %v428_v53, %v1702_v6  ;;  %v1737_v19 = vmul.f32 %v431_v54, %v1700_v5  ;;  %v1740_v20 = vmul.f32 %v431_v54, %v1718_v14  ;;  %v517_v21 = vmul.f32 %v505_v55, %v1698_v4 }
  0xbd   : > { %536 = vrot.lane.b32.xlu0 %v518_v7, %s2326_s4  ;;  %v519_v22 = vmul.f32 %v508_v58, %v1700_v5  ;;  %v1811_v51 = vmul.f32 %v569_v31, %v1668_v56  ;;  %v1819_v55 = vmul.f32 %v572_v32, %v1670_v57  ;;  %v1829_v8 = vmul.f32 %v1784_v36, %v1668_v56 }
  0xbe   : > { %534 = vrot.lane.b32.xlu1 %v517_v21, %s2326_s4  ;;  %v1781_v35 = vld [vmem:[#allocation2 + $0x30] sm:$0xff]  ;;  %v1813_v52 = vld [vmem:[#allocation2 + $0x38] sm:$0xff]  ;;  %v1842_v23 = vmul.f32 %v569_v31, %v1702_v6  ;;  %v828_v7 = vmul.f32 %v1794_v42, %v1668_v56  ;;  %v1848_v50 = vmul.f32 %v1794_v42, %v1698_v4  ;;  %v1862_v54 = vmul.f32 %v572_v32, %v1700_v5 }
  0xbf   : > { %v520_v48 = vmul.f32 %v511_v29, %v1781_v35  ;;  %v521_v58 = vmul.f32 %v511_v29, %v1813_v52  ;;  %v1836_v29 = vmul.f32 %v569_v31, %v1698_v4  ;;  %v604_v3 = vrot.slane %v1811_v51, 1 }
  0xc0   : > { %2363 = vst [vmem:[#allocation23_spill] sm:$0xff] %v1848_v50  ;;  %v609_v24 = vrot.slane %v1819_v55, 1  ;;  %v1869_v49 = vmul.f32 %v1784_v36, %v1698_v4  ;;  %v607_v51 = vrot.slane %v1842_v23, 1  ;;  %v765_v31 = vmul.f32 %v753_v38, %v1698_v4 }
  0xc1   : > { %540 = vrot.lane.b32.xlu0 %v520_v48, %s2362_s0  ;;  %v605_v21 = vrot.slane %v1836_v29, 1  ;;  %v852_v60 = vrot.slane %v828_v7, 1  ;;  %v920_v55 = vmul.f32 %v1801_v45, %v1668_v56  ;;  %v1881_v40 = vmul.f32 %v1801_v45, %v1698_v4 }
  0xc2   : > { %538 = vrot.lane.b32.xlu1 %v519_v22, %s2326_s4  ;;  %s1209_s4 = spop %1208  ;;  %v1799_v44 = vld [vmem:[#allocation2 + $0x48] sm:$0xff]  ;;  %v1831_v9 = vld [vmem:[#allocation2 + $0x50] sm:$0xff]  ;;  %v585_v22 = vmul.f32 %v572_v32, %v1718_v14  ;;  %v610_v4 = vrot.slane %v1862_v54, 1  ;;  %v586_v32 = vmul.f32 %v1776_v33, %v1781_v35  ;;  %v1911_v54 = vmul.f32 %v1776_v33, %v1813_v52 }
  0xc3   : > { %s1211_s6 = spop %1210  ;;  %v1803_v46 = vstv %s1209_s4  ;;  %v522_v59 = vmul.f32 %v514_v30, %v1799_v44  ;;  %v523_v48 = vmul.f32 %v514_v30, %v1831_v9  ;;  %v1856_v30 = vmul.f32 %v1797_v43, %v1700_v5 }
  0xc4   : > { %s1213_s7 = spop %1212  ;;  %2359 = vst [vmem:[#allocation20_spill] sm:$0xff] %v1803_v46  ;;  %v1805_v47 = vstv %s1211_s6  ;;  %v923_v23 = vmul.f32 %v1803_v46, %v1670_v57  ;;  %v612_v29 = vrot.slane %v585_v22, 1  ;;  %v944_v45 = vrot.slane %v920_v55, 2 }
  0xc5   : > { %2360 = vst [vmem:[#allocation21_spill] sm:$0xff] %v1805_v47  ;;  %v1815_v53 = vstv %s1213_s7  ;;  %2364 = vst [vmem:[#allocation24_spill] sm:$0xff] %v1856_v30  ;;  %544 = vrot.lane.b32.xlu0 %v522_v59, %s2362_s0  ;;  %v764_v59 = vmul.f32 %v753_v38, %v1668_v56  ;;  %v1888_v38 = vmul.f32 %v1803_v46, %v1700_v5  ;;  %v2367_v46 = vstv %s1696_s29 }
  0xc6   : > { %2361 = vst [vmem:[#allocation22_spill] sm:$0xff] %v1815_v53  ;;  %542 = vrot.lane.b32.xlu1 %v521_v58, %s2362_s0  ;;  %v831_v58 = vmul.f32 %v1797_v43, %v1670_v57  ;;  %v926_v7 = vmul.f32 %v1805_v47, %v1781_v35  ;;  %v1894_v56 = vmul.f32 %v1805_v47, %v1813_v52  ;;  %v2368_v22 = vrot.slane %v1856_v30, 1 }
  0xc7   : > { %v949_v42 = vrot.slane %v923_v23, 2  ;;  %v611_v14 = vsel %vm386_vm6, %v609_v24, %v610_v4  ;;  %v2377_v24 = vrot.slane %v1911_v54, 1 }
  0xc8   : > { %v857_v41 = vrot.slane %v831_v58, 1  ;;  %v929_v58 = vmul.f32 %v1815_v53, %v1799_v44 }
  0xc9   : > { %780 = vrot.lane.b32.xlu0 %v764_v59, %s1400_s1  ;;  %v1904_v59 = vmul.f32 %v1815_v53, %v1831_v9  ;;  %v767_v53 = vmul.f32 %v2367_v46, %v1700_v5 }
  0xca   : > { %546 = vrot.lane.b32.xlu1 %v523_v48, %s2362_s0  ;;  %v766_v48 = vmul.f32 %v2328_v39, %v1670_v57  ;;  %v2365_v39 = vrot.slane %v1848_v50, 1  ;;  %v1926_v43 = vsel %vm386_vm6, %v857_v41, %v2368_v22  ;;  %v959_v55 = vrot.slane %v929_v58, 2 }
  0xcb   : > { %2369 = vst [vmem:[#allocation26_spill] sm:$0xff] %v1926_v43  ;;  %v614_v22 = vrot.slane %v586_v32, 1  ;;  %v1948_v58 = vmul.f32 %v1779_v34, %v1831_v9  ;;  %v2374_v50 = vrot.slane %v1881_v40, 2  ;;  %v1965_v43 = vld [vmem:[#allocation2 + $0x58] sm:$0x3] }
  0xcc   : > { %v1916_v47 = vsel %vm386_vm6, %v852_v60, %v2365_v39  ;;  %v1929_v39 = vld [vmem:[#allocation2 + $0x40] sm:$0x3]  ;;  %v954_v60 = vrot.slane %v926_v7, 2  ;;  %v1944_v7 = vmul.f32 %v1779_v34, %v1799_v44 }
  0xcd   : > { %2366 = vst [vmem:[#allocation25_spill] sm:$0xff] %v1916_v47  ;;  %784 = vrot.lane.b32.xlu0 %v766_v48, %s1400_s1  ;;  %v2370_v48 = vstv %s1720_s5  ;;  %v1939_v23 = vmul.f32 %v1776_v33, %v1929_v39  ;;  %v1963_v30 = vsel %vm463_vm7, %v944_v45, %v2374_v50  ;;  %v606_v47 = vsel %vm386_vm6, %v604_v3, %v605_v21 }
  0xce   : > { %782 = vrot.lane.b32.xlu1 %v765_v31, %s1400_s1  ;;  %v768_v41 = vmul.f32 %v2370_v48, %v1781_v35  ;;  %v2372_v31 = vstv %s1742_s8  ;;  %v1980_v50 = vmul.f32 %v1779_v34, %v1965_v43  ;;  %v2376_v3 = vrot.slane %v1894_v56, 2 }
  0xcf   : > { %v770_v33 = vmul.f32 %v2372_v31, %v1799_v44  ;;  %v2373_v32 = vmov %v2372_v31  ;;  %v617_v45 = vrot.slane %v1939_v23, 1  ;;  %v2379_v34 = vrot.slane %v1713_v12, 1 }
  0xd0   : > { %v771_v46 = vmul.f32 %v2373_v32, %v1831_v9  ;;  %v613_v32 = vsel %vm386_vm6, %v610_v4, %v612_v29  ;;  %v2378_v4 = vrot.slane %v1904_v59, 2  ;;  %v2389_v12 = vrot.slane %v1737_v19, 2 }
  0xd1   : > { %788 = vrot.lane.b32.xlu0 %v768_v41, %s1400_s1  ;;  %v608_v41 = vsel %vm386_vm6, %v605_v21, %v607_v51  ;;  %v1985_v21 = vsel %vm463_vm7, %v954_v60, %v2376_v3  ;;  %v2380_v60 = vrot.slane %v1680_v63, 1  ;;  %v2382_v3 = vrot.slane %v1690_v1, 2 }
  0xd2   : > { %786 = vrot.lane.b32.xlu1 %v767_v53, %s1400_s1  ;;  %v2371_v53 = vmov %v2370_v48  ;;  %v2383_v51 = vrot.slane %v1716_v13, 1  ;;  %v2384_v29 = vmov %v2379_v34  ;;  %v2387_v1 = vrot.slane %v1725_v15, 1 }
  0xd3   : > { %v769_v48 = vmul.f32 %v2371_v53, %v1813_v52  ;;  %v2375_v53 = vrot.slane %v1888_v38, 2  ;;  %v368_v15 = vmul.f32 %v1760_v25, %v1781_v35  ;;  %v369_v19 = vmul.f32 %v1760_v25, %v1813_v52 }
  0xd4   : > { %v697_v23 = vrot.slane %v1869_v49, 2 }
  0xd5   : > { %v1973_v31 = vsel %vm463_vm7, %v949_v42, %v2375_v53  ;;  %v616_v42 = vsel %vm386_vm6, %v614_v22, %v2377_v24  ;;  %792 = vrot.lane.b32.xlu0 %v770_v33, %s1400_s1  ;;  %v389_v53 = vsel %vm386_vm6, %v2380_v60, %v2379_v34  ;;  %v2381_v22 = vrot.slane %v1731_v17, 2 }
  0xd6   : > { %790 = vrot.lane.b32.xlu1 %v769_v48, %s1400_s1  ;;  %v1995_v48 = vsel %vm463_vm7, %v959_v55, %v2378_v4  ;;  %v391_v55 = vsel %vm386_vm6, %v2384_v29, %v2383_v51  ;;  %v2385_v33 = vrot.slane %v1734_v18, 2  ;;  %v415_v34 = vadd.f32 %v389_v53, %v1674_v61 }
  0xd7   : > { %v466_v24 = vsel %vm463_vm7, %v2382_v3, %v2381_v22  ;;  %v2386_v4 = vmov %v2381_v22  ;;  %v416_v60 = vadd.f32 %v391_v55, %v1707_v10  ;;  %v2388_v22 = vrot.slane %v1683_v0, 1 }
  0xd8   : > { %v468_v63 = vsel %vm463_vm7, %v2386_v4, %v2385_v33  ;;  %v2390_v51 = vrot.slane %v1693_v2, 2  ;;  %v2391_v61 = vrot.slane %v1728_v16, 1  ;;  %v2392_v10 = vmov %v2387_v1 }
  0xd9   : > { %v394_v13 = vsel %vm386_vm6, %v2388_v22, %v2387_v1  ;;  %v2393_v0 = vrot.slane %v1740_v20, 2  ;;  %v2394_v53 = vmov %v2389_v12  ;;  %v2395_v2 = vstv %s1619_s30  ;;  %624 = vrot.lane.b32.xlu0 %v606_v47, %s2362_s0  ;;  %s1401_s30 = smov [#allocation6]  }
  0xda   : > { %v471_v18 = vsel %vm463_vm7, %v2390_v51, %v2389_v12  ;;  %794 = vrot.lane.b32.xlu1 %v771_v46, %s1400_s1  ;;  %v417_v17 = vadd.f32 %v394_v13, %v1677_v62  ;;  %v396_v29 = vsel %vm386_vm6, %v2392_v10, %v2391_v61  ;;  %v334_v55 = vmul.f32 %v2395_v2, %v1781_v35 }
  0xdb   : > { %v473_v3 = vsel %vm463_vm7, %v2394_v53, %v2393_v0  ;;  %v2045_v33 = vadd.f32 %v466_v24, %v415_v34  ;;  %v2047_v46 = vadd.f32 %v468_v63, %v416_v60  ;;  %v418_v62 = vadd.f32 %v396_v29, %v1710_v11 }
  0xdc   : > { %v2053_v16 = vadd.f32 %v471_v18, %v417_v17  ;;  %v445_v20 = vmul.f32 %v1766_v27, %v1781_v35  ;;  %v446_v24 = vmul.f32 %v1766_v27, %v1813_v52  ;;  %v397_v11 = vrot.slane %v368_v15, 1 }
  0xdd   : > { %v2061_v4 = vadd.f32 %v473_v3, %v418_v62  ;;  %v2396_v63 = vmov %v2395_v2  ;;  %v370_v47 = vmul.f32 %v1760_v25, %v1929_v39  ;;  %v398_v60 = vrot.slane %v369_v19, 1  ;;  %628 = vrot.lane.b32.xlu0 %v611_v14, %s2362_s0 }
  0xde   : > { %v335_v34 = vmul.f32 %v2396_v63, %v1813_v52  ;;  %626 = vrot.lane.b32.xlu1 %v608_v41, %s2362_s0  ;;  %v474_v1 = vrot.slane %v445_v20, 2  ;;  %v475_v22 = vrot.slane %v446_v24, 2  ;;  %v447_v13 = vmul.f32 %v1766_v27, %v1929_v39 }
  0xdf   : > { %v400_v12 = vrot.slane %v370_v47, 1  ;;  %v2397_v51 = vstv %s1621_s3  ;;  %v371_v17 = vmul.f32 %v1763_v26, %v1799_v44  ;;  %v372_v61 = vmul.f32 %v1763_v26, %v1831_v9  ;;  %s1316_s3 = sshll.u32 %s1401_s30, 4  ;;  %s1317_s3 = int_to_ptr.vmem [resolvable:$false] %s1316_s3 }
  0xe0   : > { %v336_v18 = vmul.f32 %v2397_v51, %v1799_v44  ;;  %v399_v25 = vsel %vm386_vm6, %v397_v11, %v398_v60  ;;  %v476_v41 = vsel %vm463_vm7, %v474_v1, %v475_v22  ;;  %v477_v10 = vrot.slane %v447_v13, 2  ;;  %s1318_s16 = scalar_lea.vmem %s1317_s3, 2048 }
  0xe1   : > { %v448_v27 = vmul.f32 %v1769_v28, %v1799_v44  ;;  %v419_v29 = vadd.f32 %v399_v25, %v334_v55  ;;  %v401_v0 = vsel %vm386_vm6, %v398_v60, %v400_v12  ;;  %v402_v53 = vrot.slane %v371_v17, 1  ;;  %632 = vrot.lane.b32.xlu0 %v616_v42, %s2362_s0  ;;  %v2402_v25 = vld [vmem:[#allocation16_spill] sm:$0xff] }
  0xe2   : > { %v403_v3 = vrot.slane %v372_v61, 1  ;;  %630 = vrot.lane.b32.xlu1 %v613_v32, %s2362_s0  ;;  %v420_v2 = vadd.f32 %v401_v0, %v335_v34  ;;  %v478_v62 = vsel %vm463_vm7, %v475_v22, %v477_v10  ;;  %v449_v14 = vmul.f32 %v1769_v28, %v1831_v9 }
  0xe3   : > { %v479_v15 = vrot.slane %v448_v27, 2  ;;  %v2088_v19 = vadd.f32 %v476_v41, %v419_v29  ;;  %v2398_v24 = vmov %v2397_v51  ;;  %v373_v11 = vmul.f32 %v1763_v26, %v1965_v43 }
  0xe4   : > { %v404_v20 = vsel %vm386_vm6, %v402_v53, %v403_v3  ;;  %v337_v55 = vmul.f32 %v2398_v24, %v1831_v9  ;;  %v2097_v32 = vadd.f32 %v478_v62, %v420_v2  ;;  %v480_v34 = vrot.slane %v449_v14, 2 }
  0xe5   : > { %v421_v63 = vadd.f32 %v404_v20, %v336_v18  ;;  %v450_v47 = vmul.f32 %v1769_v28, %v1965_v43  ;;  %v674_v60 = vmul.f32 %v1784_v36, %v1702_v6  ;;  %v2399_v1 = vrot.slane %v1911_v54, 1 }
  0xe6   : > { %v622_v26 = vrot.slane %v1980_v50, 1  ;;  %v405_v42 = vrot.slane %v373_v11, 1  ;;  %v675_v13 = vmul.f32 %v1787_v37, %v1670_v57  ;;  %v676_v12 = vmul.f32 %v1787_v37, %v1700_v5 }
  0xe7   : > { %v618_v22 = vsel %vm386_vm6, %v2399_v1, %v617_v45  ;;  %v481_v28 = vsel %vm463_vm7, %v479_v15, %v480_v34  ;;  %v482_v36 = vrot.slane %v450_v47, 2  ;;  %v2400_v54 = vrot.slane %v1948_v58, 1 }
  0xe8   : > { %634 = vrot.lane.b32.xlu1 %v618_v22, %s2362_s0  ;;  %v2401_v45 = vrot.slane %v1944_v7, 1  ;;  %v2121_v51 = vadd.f32 %v481_v28, %v421_v63  ;;  %v406_v57 = vsel %vm386_vm6, %v403_v3, %v405_v42  ;;  %v667_v18 = vstv %s1659_s11  ;;  %v2404_v22 = vld [vmem:[#allocation17_spill] sm:$0xff] }
  0xe9   : > { %v422_v5 = vadd.f32 %v406_v57, %v337_v55  ;;  %v483_v17 = vsel %vm463_vm7, %v480_v34, %v482_v36  ;;  %v696_v61 = vrot.slane %v1829_v8, 2  ;;  %v699_v49 = vrot.slane %v674_v60, 2 }
  0xea   : > { %v621_v50 = vsel %vm386_vm6, %v2401_v45, %v2400_v54  ;;  %v677_v41 = vmul.f32 %v1787_v37, %v2402_v25  ;;  %v2403_v7 = vmov %v2400_v54  ;;  %v701_v27 = vrot.slane %v675_v13, 2 }
  0xeb   : > { %636 = vrot.lane.b32.xlu0 %v621_v50, %s2362_s0  ;;  %v623_v10 = vsel %vm386_vm6, %v2403_v7, %v622_v26  ;;  %v702_v29 = vrot.slane %v676_v12, 2  ;;  %v2134_v0 = vadd.f32 %v483_v17, %v422_v5  ;;  %v698_v53 = vsel %vm463_vm7, %v696_v61, %v697_v23  ;;  %v2406_v5 = vld [vmem:[#allocation25_spill] sm:$0xff]  ;;  %v2407_v61 = vld [vmem:[#allocation23_spill] sm:$0xff] }
  0xec   : > { %638 = vrot.lane.b32.xlu1 %v623_v10, %s2362_s0  ;;  %v678_v3 = vmul.f32 %v667_v18, %v1781_v35  ;;  %v679_v8 = vmul.f32 %v667_v18, %v1813_v52  ;;  %v670_v2 = vstv %s1666_s10  ;;  %v704_v37 = vrot.slane %v677_v41, 2  ;;  %s2420_s10 = sshll.u32 %s1503_s20, 6 }
  0xed   : > { %v700_v58 = vsel %vm463_vm7, %v697_v23, %v699_v49  ;;  %v680_v62 = vmul.f32 %v667_v18, %v1929_v39  ;;  %v703_v14 = vsel %vm463_vm7, %v701_v27, %v702_v29  ;;  %v681_v24 = vmul.f32 %v670_v2, %v1799_v44  ;;  %v2405_v23 = vld [vmem:[#allocation18_spill] sm:$0xff]  ;;  %s2239_s11 = scalar_lea.vmem [#allocation6], %s2420_s10 }
  0xee   : > { %v706_v15 = vrot.slane %v678_v3, 2  ;;  %v707_v20 = vrot.slane %v679_v8, 2  ;;  %v682_v55 = vmul.f32 %v670_v2, %v1831_v9  ;;  %v705_v11 = vsel %vm463_vm7, %v702_v29, %v704_v37 }
  0xef   : > { %716 = vrot.lane.b32.xlu0 %v698_v53, %s2362_s0  ;;  %v709_v63 = vrot.slane %v680_v62, 2  ;;  %v683_v34 = vmul.f32 %v670_v2, %v1965_v43  ;;  %v711_v60 = vrot.slane %v681_v24, 2  ;;  %v830_v26 = vmul.f32 %v2404_v22, %v1702_v6  ;;  %v2410_v53 = vld [vmem:[#allocation24_spill] sm:$0xff] }
  0xf0   : > { %718 = vrot.lane.b32.xlu1 %v700_v58, %s2362_s0  ;;  %v708_v47 = vsel %vm463_vm7, %v706_v15, %v707_v20  ;;  %v712_v1 = vrot.slane %v682_v55, 2  ;;  %v823_v28 = vstv %s1752_s26  ;;  %v833_v54 = vmul.f32 %v2405_v23, %v2402_v25 }
  0xf1   : > { %v710_v42 = vsel %vm463_vm7, %v707_v20, %v709_v63  ;;  %v714_v13 = vrot.slane %v683_v34, 2  ;;  %v855_v36 = vrot.slane %v830_v26, 1  ;;  %v834_v50 = vmul.f32 %v823_v28, %v1781_v35  ;;  %v2416_v26 = vld [vmem:[#allocation22_spill] sm:$0xff] }
  0xf2   : > { %v713_v12 = vsel %vm463_vm7, %v711_v60, %v712_v1  ;;  %v835_v57 = vmul.f32 %v823_v28, %v1813_v52  ;;  %v826_v18 = vstv %s1754_s14  ;;  %v860_v17 = vrot.slane %v833_v54, 1  ;;  %v2409_v52 = vld [vmem:[#allocation26_spill] sm:$0xff]  ;;  %s1022_s14 = sshll.u32 %s2239_s11, 4  ;;  %s2263_s14 = int_to_ptr.vmem [resolvable:$true] %s1022_s14 }
  0xf3   : > { %720 = vrot.lane.b32.xlu0 %v703_v14, %s2362_s0  ;;  %v715_v45 = vsel %vm463_vm7, %v712_v1, %v714_v13  ;;  %v2408_v49 = vrot.slane %v2407_v61, 1  ;;  %v836_v7 = vmul.f32 %v823_v28, %v1929_v39  ;;  %v862_v10 = vrot.slane %v834_v50, 1  ;;  %s1312_s25 = scalar_lea.vmem %s2263_s14, 1024  ;;  %p1319_p1 = scmp.lt.s32.totalorder %s2263_s14, %s1317_s3 }
  0xf4   : > { %722 = vrot.lane.b32.xlu1 %v705_v11, %s2362_s0  ;;  %v863_v27 = vrot.slane %v835_v57, 1  ;;  %v837_v29 = vmul.f32 %v826_v18, %v1799_v44  ;;  %v838_v35 = vmul.f32 %v826_v18, %v1831_v9  ;;  %v2411_v3 = vrot.slane %v2410_v53, 1  ;;  %v2412_v44 = vld [vmem:[#allocation19_spill] sm:$0xff]  ;;  %v2413_v11 = vld [vmem:[#allocation20_spill] sm:$0xff]  ;;  %p1313_p8 = scmp.ne.s32.totalorder %s2263_s14, %s1312_s25  ;;  %p1320_p3 = scmp.lt.s32.totalorder %s1318_s16, %s1312_s25 }
  0xf5   : > { %v856_v41 = vsel %vm386_vm6, %v2408_v49, %v855_v36  ;;  %v865_v2 = vrot.slane %v836_v7, 1  ;;  %v839_v37 = vmul.f32 %v826_v18, %v1965_v43  ;;  %v922_v9 = vmul.f32 %v2412_v44, %v1702_v6 }
  0xf6   : > { %v861_v8 = vsel %vm386_vm6, %v2411_v3, %v860_v17  ;;  %v864_v58 = vsel %vm386_vm6, %v862_v10, %v863_v27  ;;  %v867_v62 = vrot.slane %v837_v29, 1  ;;  %v868_v14 = vrot.slane %v838_v35, 1  ;;  %p1314_p12 = pnand %p1313_p8, %p1470_p9  ;;  %p1321_p5 = por %p1320_p3, %p1319_p1 }
  0xf7   : > { %724 = vrot.lane.b32.xlu0 %v708_v47, %s2362_s0  ;;  %v866_v15 = vsel %vm386_vm6, %v863_v27, %v865_v2  ;;  %v870_v20 = vrot.slane %v839_v37, 1  ;;  %v947_v55 = vrot.slane %v922_v9, 2  ;;  %v925_v63 = vmul.f32 %v2413_v11, %v2402_v25  ;;  %v2414_v47 = vld [vmem:[#allocation21_spill] sm:$0xff] }
  0xf8   : > { %726 = vrot.lane.b32.xlu1 %v710_v42, %s2362_s0  ;;  %v869_v24 = vsel %vm386_vm6, %v867_v62, %v868_v14  ;;  %v928_v60 = vmul.f32 %v2414_v47, %v1929_v39  ;;  %v2415_v1 = vrot.slane %v1881_v40, 2  ;;  %v931_v42 = vmul.f32 %v2416_v26, %v1965_v43  ;;  %p1315_p0 = pneg %p1314_p12 }
  0xf9   : > { %v871_v34 = vsel %vm386_vm6, %v868_v14, %v870_v20  ;;  %v952_v6 = vrot.slane %v925_v63, 2  ;;  %v2417_v13 = vrot.slane %v1888_v38, 2  ;;  %v2418_v39 = vrot.slane %v1894_v56, 2 }
  0xfa   : > { %v948_v22 = vsel %vm463_vm7, %v2415_v1, %v947_v55  ;;  %v957_v25 = vrot.slane %v928_v60, 2  ;;  %v962_v40 = vrot.slane %v931_v42, 2  ;;  %v2419_v43 = vrot.slane %v1904_v59, 2  ;;  %p1322_p6 = pnand %p1321_p5, %p1315_p0 }
  0xfb   : > { %728 = vrot.lane.b32.xlu0 %v713_v12, %s2362_s0 }
  0xfc   : > { %730 = vrot.lane.b32.xlu1 %v715_v45, %s2362_s0  ;;  %v958_v12 = vsel %vm463_vm7, %v2418_v39, %v957_v25  ;;  %v963_v38 = vsel %vm463_vm7, %v2419_v43, %v962_v40 }
  0xff   : > { %872 = vrot.lane.b32.xlu0 %v2406_v5, %s1400_s1 }
 0x100   : > { %874 = vrot.lane.b32.xlu1 %v856_v41, %s1400_s1 }
 0x103   : > { %876 = vrot.lane.b32.xlu0 %v2409_v52, %s1400_s1 }
 0x104   : > { %878 = vrot.lane.b32.xlu1 %v861_v8, %s1400_s1 }
 0x107   : > { %880 = vrot.lane.b32.xlu0 %v864_v58, %s1400_s1 }
 0x108   : > { %882 = vrot.lane.b32.xlu1 %v866_v15, %s1400_s1 }
 0x10b   : > { %884 = vrot.lane.b32.xlu0 %v869_v24, %s1400_s1 }
 0x10c   : > { %886 = vrot.lane.b32.xlu1 %v871_v34, %s1400_s1 }
 0x10f   : > { %964 = vrot.lane.b32.xlu0 %v1963_v30, %s1400_s1  ;;  %v953_v30 = vsel %vm463_vm7, %v2417_v13, %v952_v6 }
 0x110   : > { %966 = vrot.lane.b32.xlu1 %v948_v22, %s1400_s1 }
 0x113   : > { %968 = vrot.lane.b32.xlu0 %v1973_v31, %s1400_s1 }
 0x114   : > { %970 = vrot.lane.b32.xlu1 %v953_v30, %s1400_s1 }
 0x117   : > { %972 = vrot.lane.b32.xlu0 %v1985_v21, %s1400_s1 }
 0x118   : > { %974 = vrot.lane.b32.xlu1 %v958_v12, %s1400_s1 }
 0x11b   : > { %976 = vrot.lane.b32.xlu0 %v1995_v48, %s1400_s1 }
 0x11c   : > { %978 = vrot.lane.b32.xlu1 %v963_v38, %s1400_s1 }
 0x12b   : > { %v533_v31 = vpop.permute.xlu0 %532 }
 0x12c   : > { %v556_v28 = vadd.f32 %v533_v31, %v2045_v33 }
 0x12f   : > { %v537_v21 = vpop.permute.xlu0 %536 }
 0x130   : > { %v558_v36 = vadd.f32 %v537_v21, %v2053_v16  ;;  %v535_v56 = vpop.permute.xlu1 %534 }
 0x131   : > { %v557_v23 = vadd.f32 %v535_v56, %v2047_v46 }
 0x133   : > { %v541_v50 = vpop.permute.xlu0 %540 }
 0x134   : > { %v539_v54 = vpop.permute.xlu1 %538  ;;  %v560_v48 = vadd.f32 %v541_v50, %v2088_v19 }
 0x135   : > { %v559_v45 = vadd.f32 %v539_v54, %v2061_v4 }
 0x137   : > { %v545_v18 = vpop.permute.xlu0 %544 }
 0x138   : > { %v543_v59 = vpop.permute.xlu1 %542  ;;  %v562_v5 = vadd.f32 %v545_v18, %v2121_v51 }
 0x139   : > { %v561_v57 = vadd.f32 %v543_v59, %v2097_v32 }
 0x13b   : > { %v781_v61 = vpop.permute.xlu0 %780 }
 0x13c   : > { %v547_v17 = vpop.permute.xlu1 %546 }
 0x13d   : > { %v563_v33 = vadd.f32 %v547_v17, %v2134_v0 }
 0x13f   : > { %v785_v49 = vpop.permute.xlu0 %784 }
 0x140   : > { %v783_v16 = vpop.permute.xlu1 %782 }
 0x143   : > { %v789_v46 = vpop.permute.xlu0 %788 }
 0x144   : > { %v787_v41 = vpop.permute.xlu1 %786 }
 0x147   : > { %v2233_v4 = vpop.permute.xlu0 %792 }
 0x148   : > { %v2231_v7 = vpop.permute.xlu1 %790 }
 0x14b   : > { %v625_v19 = vpop.permute.xlu0 %624 }
 0x14c   : > { %v2235_v10 = vpop.permute.xlu1 %794  ;;  %v648_v24 = vadd.f32 %v625_v19, %v556_v28 }
 0x14f   : > { %v629_v32 = vpop.permute.xlu0 %628 }
 0x150   : > { %v627_v27 = vpop.permute.xlu1 %626  ;;  %v650_v6 = vadd.f32 %v629_v32, %v558_v36 }
 0x151   : > { %v649_v11 = vadd.f32 %v627_v27, %v557_v23 }
 0x153   : > { %v633_v35 = vpop.permute.xlu0 %632 }
 0x154   : > { %v631_v29 = vpop.permute.xlu1 %630  ;;  %v652_v42 = vadd.f32 %v633_v35, %v560_v48 }
 0x155   : > { %v651_v1 = vadd.f32 %v631_v29, %v559_v45 }
 0x15a   : > { %v635_v51 = vpop.permute.xlu1 %634 }
 0x15b   : > { %v653_v39 = vadd.f32 %v635_v51, %v561_v57 }
 0x15d   : > { %v637_v52 = vpop.permute.xlu0 %636 }
 0x15e   : > { %v639_v53 = vpop.permute.xlu1 %638  ;;  %v654_v21 = vadd.f32 %v637_v52, %v562_v5 }
 0x15f   : > { %v655_v50 = vadd.f32 %v639_v53, %v563_v33 }
 0x161   : > { %v717_v0 = vpop.permute.xlu0 %716 }
 0x162   : > { %v719_v3 = vpop.permute.xlu1 %718  ;;  %v740_v63 = vadd.f32 %v717_v0, %v648_v24 }
 0x163   : > { %v741_v47 = vadd.f32 %v719_v3, %v649_v11 }
 0x164   : > { %v804_v25 = vadd.f32 %v781_v61, %v740_v63 }
 0x165   : > { %v721_v8 = vpop.permute.xlu0 %720  ;;  %v805_v40 = vadd.f32 %v783_v16, %v741_v47 }
 0x166   : > { %v723_v2 = vpop.permute.xlu1 %722  ;;  %v742_v22 = vadd.f32 %v721_v8, %v650_v6 }
 0x167   : > { %v743_v13 = vadd.f32 %v723_v2, %v651_v1 }
 0x168   : > { %v806_v31 = vadd.f32 %v785_v49, %v742_v22 }
 0x169   : > { %v725_v37 = vpop.permute.xlu0 %724  ;;  %v807_v54 = vadd.f32 %v787_v41, %v743_v13 }
 0x16a   : > { %v727_v58 = vpop.permute.xlu1 %726  ;;  %v744_v43 = vadd.f32 %v725_v37, %v652_v42 }
 0x16b   : > { %v745_v56 = vadd.f32 %v727_v58, %v653_v39 }
 0x16c   : > { %v808_v18 = vadd.f32 %v789_v46, %v744_v43 }
 0x16d   : > { %v729_v62 = vpop.permute.xlu0 %728  ;;  %v809_v49 = vadd.f32 %v2231_v7, %v745_v56 }
 0x16e   : > { %v731_v14 = vpop.permute.xlu1 %730  ;;  %v746_v59 = vadd.f32 %v729_v62, %v654_v21 }
 0x16f   : > { %v747_v61 = vadd.f32 %v731_v14, %v655_v50 }
 0x170   : > { %v810_v27 = vadd.f32 %v2233_v4, %v746_v59 }
 0x171   : > { %v873_v44 = vpop.permute.xlu0 %872  ;;  %v811_v35 = vadd.f32 %v2235_v10, %v747_v61 }
 0x172   : > { %v875_v9 = vpop.permute.xlu1 %874  ;;  %v896_v30 = vadd.f32 %v873_v44, %v804_v25 }
 0x173   : > { %v897_v38 = vadd.f32 %v875_v9, %v805_v40 }
 0x175   : > { %v877_v15 = vpop.permute.xlu0 %876 }
 0x176   : > { %v879_v20 = vpop.permute.xlu1 %878  ;;  %v898_v23 = vadd.f32 %v877_v15, %v806_v31 }
 0x177   : > { %v899_v57 = vadd.f32 %v879_v20, %v807_v54 }
 0x179   : > { %v881_v55 = vpop.permute.xlu0 %880 }
 0x17a   : > { %v883_v34 = vpop.permute.xlu1 %882  ;;  %v900_v16 = vadd.f32 %v881_v55, %v808_v18 }
 0x17b   : > { %v901_v19 = vadd.f32 %v883_v34, %v809_v49 }
 0x17d   : > { %v885_v60 = vpop.permute.xlu0 %884 }
 0x17e   : > { %v887_v26 = vpop.permute.xlu1 %886  ;;  %v902_v29 = vadd.f32 %v885_v60, %v810_v27 }
 0x17f   : > { %v903_v52 = vadd.f32 %v887_v26, %v811_v35 }
 0x181   : > { %v965_v12 = vpop.permute.xlu0 %964 }
 0x182   : > { %v988_v28 = vadd.f32 %v965_v12, %v896_v30  ;;  %v967_v36 = vpop.permute.xlu1 %966 }
 0x183   : > { %v989_v45 = vadd.f32 %v967_v36, %v897_v38 }
 0x184   : > { %997 = vst.msk [vmem:[%s2239_s11] sm:$0xff] %vm996_vm8, %v988_v28 }
 0x185   : > { %v969_v48 = vpop.permute.xlu0 %968  ;;  %998 = vst.msk [vmem:[%s2239_s11 + $0x8] sm:$0xff] %vm996_vm8, %v989_v45 }
 0x186   : > { %v990_v5 = vadd.f32 %v969_v48, %v898_v23  ;;  %v971_v17 = vpop.permute.xlu1 %970 }
 0x187   : > { %v991_v33 = vadd.f32 %v971_v17, %v899_v57 }
 0x188   : > { %999 = vst.msk [vmem:[%s2239_s11 + $0x10] sm:$0xff] %vm996_vm8, %v990_v5 }
 0x189   : > { %v973_v41 = vpop.permute.xlu0 %972  ;;  %1000 = vst.msk [vmem:[%s2239_s11 + $0x18] sm:$0xff] %vm996_vm8, %v991_v33 }
 0x18a   : > { %v992_v46 = vadd.f32 %v973_v41, %v900_v16  ;;  %v975_v32 = vpop.permute.xlu1 %974 }
 0x18b   : > { %v993_v7 = vadd.f32 %v975_v32, %v901_v19 }
 0x18c   : > { %1001 = vst.msk [vmem:[%s2239_s11 + $0x20] sm:$0xff] %vm996_vm8, %v992_v46 }
 0x18d   : > { %v977_v51 = vpop.permute.xlu0 %976  ;;  %1002 = vst.msk [vmem:[%s2239_s11 + $0x28] sm:$0xff] %vm996_vm8, %v993_v7 }
 0x18e   : > { %v994_v4 = vadd.f32 %v977_v51, %v902_v29  ;;  %v979_v53 = vpop.permute.xlu1 %978 }
 0x18f   : > { %v995_v10 = vadd.f32 %v979_v53, %v903_v52 }
 0x190   : > { %1003 = vst.msk [vmem:[%s2239_s11 + $0x30] sm:$0xff] %vm996_vm8, %v994_v4 }
 0x191   : > { %1004 = vst.msk [vmem:[%s2239_s11 + $0x38] sm:$0xff] %vm996_vm8, %v995_v10 }
 0x192   : > { %1325 = shalt.err (!%p1322_p6)
}
 0x193   : > { %s1326_s18 = scalar_lea.hbm %s2261_s24, 1024  ;;  %s1330_s28 = scalar_lea.hbm %s2317_s2, 2048 }
 0x194   : > { %p1327_p7 = scmp.ne.s32.totalorder %s2261_s24, %s1326_s18  ;;  %p1331_p13 = scmp.lt.s32.totalorder %s2261_s24, %s2317_s2 }
 0x195   : > { %p1332_p2 = scmp.lt.s32.totalorder %s1330_s28, %s1326_s18 }
 0x196   : > { %p1328_p10 = pnand %p1327_p7, %p1470_p9 }
 0x197   : > { %p1333_p8 = por %p1332_p2, %p1331_p13 }
 0x198   : > { %p1329_p4 = pneg %p1328_p10 }
 0x19a   : > { %p1334_p12 = pnand %p1333_p8, %p1329_p4 }
 0x19c   : > { %1337 = shalt.err (!%p1334_p12)
}
 0x19d   : > { %s1402_s5 = smov 128   ;;  %s1403_s8 = smov 8  }
 0x19e   : > { %1216 = dma.vmem_to_hbm [thread:$0]  (%p1470_p9), %s2263_s14, 1024, %s2261_s24, %s1006_s12, %s1402_s5, %s1402_s5, %s1403_s8  }
 0x19f PF: > { %s2422_s19 = sld [smem:[#allocation12_spill]]  ;;  %s1037_s26 = sand.u32 1, %s1372_s9  }
 0x1a0   : > { %s1038_s6 = scalar_lea.sflag [#allocation5], %s1037_s26 }
 0x1a5   : > { %p2423_p0 = scmp.ge.s32.totalorder %s2422_s19, 2 }
 0x1a7   : > { %p1223_p1 = pnand %p2423_p0, %p1477_p11 }
 0x1a9   : > { %p1224_p3 = pneg %p1223_p1 }
 0x1ab   : > { %1367 = dma.done.wait (%p1224_p3), %s1038_s6, 1024  }
 0x1ac   : > { %1369 = vsyncadd (%p1224_p3), %s1038_s6, 4294966272  ;;  %s18_s14 = sadd.s32 1, %s2422_s19   ;;  %s2424_s9 = sld [smem:[#allocation9_spill]] }
 0x1ad   : > { %p15_p5 = scmp.ge.s32.totalorder %s18_s14, 4   ;;  %s2425_s10 = sld [smem:[#allocation10_spill]] }
 0x1ae   : > { %s2426_s11 = sld [smem:[#allocation14_spill]] }
 0x1af   : > { %s2427_s12 = sld [smem:[#allocation11_spill]]  ;;  %17 = sbr.rel (!%p15_p5) target bundleno = 9 (0x9), region = 76 }
 0x1b0   : > { %s2428_s13 = sld [smem:[#allocation13_spill]] }
 0x1b4   :  { %1043 = vsyncpa [#allocation4], 1 }
 0x1b5   :  { %1045 = vsyncpa [#allocation4 + $0x1], 1 }
 0x1b6   :  { %1046 = vsyncpa [#allocation5], 1 }
 0x1b7   :  { %1048 = vsyncpa [#allocation5 + $0x1], 1 }

</bundles_post_ra>
